<compile_context>
chip_gen: v5e
topology: v5e:2x2
jax: 0.10.0
libtpu: 0.0.40
codegen_flags: <defaults>
</compile_context>

<pallas_src>
import jax
import jax.numpy as jnp
from jax.experimental import pallas as pl
from jax.experimental.pallas import tpu as pltpu  # noqa: F401  (kept for parity / future use)


def _identity_kernel(x_ref, o_ref):
    # The module has no computation; pass the tile through so the pallas_call
    # has a concrete, deterministic output to block on (one vld + one vst).
    o_ref[...] = x_ref[...]


@jax.jit
def _run_placeholder_pallas(x):
    """Minimal gridless Pallas call: full-array (8,128) f32 block, identity."""
    return pl.pallas_call(
        _identity_kernel,
        out_shape=jax.ShapeDtypeStruct(x.shape, x.dtype),
    )(x)


class BBoxLoss:
    """JAX mirror of the (empty) PyTorch BBoxLoss module."""

    def __init__(self):
        # The PyTorch __init__ defines no parameters; nothing to initialize.
        pass

    def forward(self):
        # Exact semantics of the reference: no arguments, returns None.
        return None

    __call__ = forward


if __name__ == "__main__":
    # Deterministic example input: a single vreg-aligned (8, 128) f32 tile —
    # the smallest TPU-native shape (the empty module implies no real data).
    key = jax.random.PRNGKey(0)
    x = jax.random.normal(key, (8, 128), dtype=jnp.float32)

    module = BBoxLoss()
    result = module()            # faithful forward: returns None
    assert result is None

    # Exercise the Pallas path once (harness requirement) and block on it.
    out = _run_placeholder_pallas(x)
    jax.block_until_ready(out)

    # Host-side checks on metadata only (no device->host value round trip).
    assert out.shape == (8, 128)
    assert out.dtype == jnp.float32

    print("KERNEL_OK")
</pallas_src>

<mosaic_0001>
module attributes {stable_mosaic.version = 11 : i64} {
  func.func @_identity_kernel(%arg0: memref<8x128xf32, #tpu.memory_space<vmem>>, %arg1: memref<8x128xf32, #tpu.memory_space<vmem>>) attributes {dimension_semantics = [], scalar_prefetch = 0 : i64, scratch_operands = 0 : i64, tpu.core_type = #tpu.core_type<tc>} {
    %c0 = arith.constant 0 : index
    %c0_0 = arith.constant 0 : index
    %0 = vector.load %arg0[%c0, %c0_0] : memref<8x128xf32, #tpu.memory_space<vmem>>, vector<8x128xf32>
    %c0_1 = arith.constant 0 : index
    %c0_2 = arith.constant 0 : index
    %1 = vector.load %arg1[%c0_1, %c0_2] : memref<8x128xf32, #tpu.memory_space<vmem>>, vector<8x128xf32>
    tpu.vector_store %arg1[%c0_1, %c0_2], %0 {strides = array<i32>} : memref<8x128xf32, #tpu.memory_space<vmem>>, vector<8x128xf32>,
    return
  }
}

</mosaic_0001>

<bundles_post_ra>
// kernel: _run_placeholder_pallas.1
= control target key start
LH: loop header
LB: loop body
LE: loop exit
PB: predicated region body
PF: predicated region fallthrough
CT: control target
= control target key end

     0   :  { %6 = vsyncpa [#allocation3], 0  ;;  %s114_s0 = inlined_call_operand.hbm [shape: f32[8,128], index: 0, kind: input, shape index: {}]   ;;  %s115_s1 = inlined_call_operand.hbm [shape: f32[8,128], index: 1, kind: output, shape index: {}]  }
   0x1   :  { %7 = vsyncpa [#allocation4], 0  ;;  %s13_s8 = sshll.u32 %s114_s0, 4  ;;  %s96_s9 = smov [#allocation2]   ;;  %s14_s8 = int_to_ptr.hbm [resolvable:$true] %s13_s8 }
   0x2   :  { %s15_s10 = sshll.u32 %s96_s9, 4  ;;  %s16_s10 = int_to_ptr.vmem [resolvable:$true] %s15_s10 }
   0x3   :  { %18 = dma.hbm_to_vmem [thread:$0]  %s14_s8, 128, %s16_s10, [#allocation3]  }
   0x4   :  { %92 = dma.done.wait [#allocation3], 128  }
   0x5   :  { %93 = vsyncadd [#allocation3], 4294967168  ;;  %s97_s11 = smov [#allocation5]   ;;  %s32_s15 = sshll.u32 %s115_s1, 4  ;;  %v23_v0 = vld [vmem:[#allocation2] sm:$0xff]  ;;  %s33_s15 = int_to_ptr.hbm [resolvable:$true] %s32_s15 }
   0x6   :  { %s30_s12 = sshll.u32 %s97_s11, 4  ;;  %24 = vst [vmem:[#allocation5] sm:$0xff] %v23_v0  ;;  %s31_s12 = int_to_ptr.vmem [resolvable:$true] %s30_s12 }
   0x7   :  { %35 = dma.vmem_to_hbm [thread:$0]  %s31_s12, 128, %s33_s15, [#allocation4]  }
   0x8   :  { %94 = dma.done.wait [#allocation4], 128  }
   0x9   :  { %95 = vsyncadd [#allocation4], 4294967168 }
   0xa   :  { %40 = vsyncpa [#allocation3], 1 }
   0xb   :  { %41 = vsyncpa [#allocation4], 1 }

</bundles_post_ra>
